<compile_context>
chip_gen: v5e
topology: v5e:2x2
jax: 0.10.0
libtpu: 0.0.40
codegen_flags: <defaults>
</compile_context>

<pallas_src>
import functools

import jax
import jax.numpy as jnp
from jax import lax
from jax.experimental import pallas as pl
from jax.experimental.pallas import tpu as pltpu


def _round_up(x, m):
    return ((x + m - 1) // m) * m


def _vg_head_kernel(nvp_ref,                                   # (1,) i32, SMEM (prefetched)
                    vis_ref, phr_ref, wv_ref, bv_ref, wp_ref, bp_ref, labels_ref,
                    scores_ref, loss_ref,
                    pvpad_ref,                                  # VMEM scratch (P_pad, D)
                    *, matmul_dtype):
    """Processes ONE image; the batch axis is the (parallel) grid axis."""
    P, _ = vis_ref.shape
    Q, _ = phr_ref.shape
    D = wv_ref.shape[1]
    P_pad = pvpad_ref.shape[0]
    num_valid = nvp_ref[0]

    # ---- projections: low-precision MXU operands, f32 accumulation/epilogue ----
    pv = jnp.dot(vis_ref[...].astype(matmul_dtype),
                 wv_ref[...].astype(matmul_dtype),
                 preferred_element_type=jnp.float32) + bv_ref[...]          # (P, D)
    pp = jnp.dot(phr_ref[...].astype(matmul_dtype),
                 wp_ref[...].astype(matmul_dtype),
                 preferred_element_type=jnp.float32) + bp_ref[...]          # (Q, D)

    # ---- L2 normalization in f32 (VPU + EUP rsqrt) ----
    pv = pv * lax.rsqrt(jnp.sum(pv * pv, axis=-1, keepdims=True) + 1e-8)
    pp = pp * lax.rsqrt(jnp.sum(pp * pp, axis=-1, keepdims=True) + 1e-8)

    # ---- stage projected proposals in a zeroed, lane-aligned scratch ----
    # (replaces the old wrapper-side jnp.pad -> no extra HBM traffic)
    if P < P_pad:                        # static shapes -> plain Python branch
        pvpad_ref[P:P_pad, :] = jnp.zeros((P_pad - P, D), matmul_dtype)
    pvpad_ref[0:P, :] = pv.astype(matmul_dtype)

    # ---- phrase/proposal similarity: contract D against the transposed rhs ----
    sim = lax.dot_general(pp.astype(matmul_dtype), pvpad_ref[...],
                          (((1,), (1,)), ((), ())),
                          preferred_element_type=jnp.float32)               # (Q, P_pad)

    # mask padded / invalid proposal columns before the softmax
    col = lax.broadcasted_iota(jnp.int32, (Q, P_pad), 1)
    sim = jnp.where(col < num_valid, sim, -1e30)

    # ---- softmax over proposals (exact normalization -> rows sum to 1) ----
    m = jnp.max(sim, axis=-1, keepdims=True)
    e = jnp.exp(sim - m)
    denom = jnp.sum(e, axis=-1, keepdims=True)
    scores_ref[...] = e / denom                                  # lane-dense (Q, P_pad)

    # ---- fused matching NLL:  sum_q ( m + log(denom) - sim[label_q] ) ----
    picked = jnp.sum(jnp.where(col == labels_ref[...], sim, 0.0),
                     axis=-1, keepdims=True)                     # (Q, 1)
    loss_ref[...] = jnp.sum(m + jnp.log(denom) - picked, keepdims=True)


def generalized_rcnn_vg_forward(vis_feat, phr_feat, wv, bv, wp, bp, labels,
                                *, matmul_dtype=jnp.bfloat16, p_pad_multiple=128):
    """Runs the VG head. Returns (losses_dict, scores) like the module in eval."""
    B, P, C = vis_feat.shape
    _, Q, E = phr_feat.shape
    D = wv.shape[1]
    assert wv.shape == (C, D) and wp.shape == (E, D)

    # Lane-aligned proposal width for the scores store / similarity-matmul N.
    # TODO(synk): pass p_pad_multiple=256 on v7x to fill its 256-wide MXU tiles.
    P_pad = _round_up(max(P, p_pad_multiple), p_pad_multiple)

    labels3 = labels.astype(jnp.int32)[:, :, None]               # (B, Q, 1)
    num_valid = jnp.array([P], dtype=jnp.int32)                  # prefetched scalar

    # VMEM budget: double-buffered per-image blocks + resident weights +
    # scratch + live temporaries, with headroom; clamped under v7x's 64 MiB.
    f32 = 4
    mm = jnp.dtype(matmul_dtype).itemsize
    blk = (P * C + Q * E + Q + Q * P_pad + 1) * f32
    weights = (C * D + E * D + 2 * D) * f32
    scratch = P_pad * D * mm
    temps = (P * D + Q * D) * (f32 + mm) + (P * C + Q * E) * mm + 4 * Q * P_pad * f32
    vmem_limit = int(min(max(2 * (2 * blk + weights + scratch + temps) + (4 << 20),
                             16 << 20), 64 << 20))

    kernel = functools.partial(_vg_head_kernel, matmul_dtype=matmul_dtype)

    grid_spec = pltpu.PrefetchScalarGridSpec(
        num_scalar_prefetch=1,
        grid=(B,),
        in_specs=[
            pl.BlockSpec((None, P, C), lambda b, nvp: (b, 0, 0)),      # vis_feat
            pl.BlockSpec((None, Q, E), lambda b, nvp: (b, 0, 0)),      # phr_feat
            pl.BlockSpec((C, D), lambda b, nvp: (0, 0)),               # Wv (resident)
            pl.BlockSpec((1, D), lambda b, nvp: (0, 0)),               # bv
            pl.BlockSpec((E, D), lambda b, nvp: (0, 0)),               # Wp
            pl.BlockSpec((1, D), lambda b, nvp: (0, 0)),               # bp
            pl.BlockSpec((None, Q, 1), lambda b, nvp: (b, 0, 0)),      # labels
        ],
        out_specs=(
            pl.BlockSpec((None, Q, P_pad), lambda b, nvp: (b, 0, 0)),  # scores (padded)
            pl.BlockSpec((None, 1, 1), lambda b, nvp: (b, 0, 0)),      # per-image NLL sum
        ),
        scratch_shapes=[pltpu.VMEM((P_pad, D), matmul_dtype)],
    )

    scores_pad, loss_part = pl.pallas_call(
        kernel,
        out_shape=(
            jax.ShapeDtypeStruct((B, Q, P_pad), jnp.float32),
            jax.ShapeDtypeStruct((B, 1, 1), jnp.float32),
        ),
        grid_spec=grid_spec,
        compiler_params=pltpu.CompilerParams(
            dimension_semantics=("parallel",),     # v7x: shard images across both TCs
            vmem_limit_bytes=vmem_limit),
    )(num_valid, vis_feat, phr_feat, wv, bv, wp, bp, labels3)

    scores = scores_pad[:, :, :P]                  # strip lane padding
    loss = jnp.sum(loss_part[:, 0, 0]) / float(B * Q)
    losses = {"vg_match_loss": loss}
    return losses, scores


def _reference_vg(vis_feat, phr_feat, wv, bv, wp, bp, labels):
    """Pure-JAX f32 reference of the same head (unpadded)."""
    pv = jnp.einsum('bpc,cd->bpd', vis_feat, wv) + bv
    pp = jnp.einsum('bqe,ed->bqd', phr_feat, wp) + bp
    pv = pv * lax.rsqrt(jnp.sum(pv * pv, axis=-1, keepdims=True) + 1e-8)
    pp = pp * lax.rsqrt(jnp.sum(pp * pp, axis=-1, keepdims=True) + 1e-8)
    sim = jnp.einsum('bqd,bpd->bqp', pp, pv)
    probs = jax.nn.softmax(sim, axis=-1)
    logp = jax.nn.log_softmax(sim, axis=-1)
    nll = -jnp.take_along_axis(logp, labels[..., None], axis=-1)
    return jnp.mean(nll), probs


if __name__ == "__main__":
    # Small, deterministic shapes consistent with the module:
    #   B images, P proposals, C = BACKBONE_OUT_CHANNELS, Q phrases,
    #   E phrase-embedding dim, D common embedding dim.
    B, P, C = 2, 32, 256
    Q, E, D = 8, 128, 128

    key = jax.random.PRNGKey(0)
    k1, k2, k3, k4, k5, k6, k7 = jax.random.split(key, 7)

    vis_feat = jax.random.normal(k1, (B, P, C), dtype=jnp.float32)
    phr_feat = jax.random.normal(k2, (B, Q, E), dtype=jnp.float32)

    # Deterministic synthetic parameters (no checkpoint load).
    wv = jax.random.normal(k3, (C, D), dtype=jnp.float32) * 0.02
    bv = jax.random.normal(k4, (1, D), dtype=jnp.float32) * 0.01
    wp = jax.random.normal(k5, (E, D), dtype=jnp.float32) * 0.02
    bp = jax.random.normal(k6, (1, D), dtype=jnp.float32) * 0.01

    labels = jax.random.randint(k7, (B, Q), 0, P, dtype=jnp.int32)

    losses, scores = generalized_rcnn_vg_forward(
        vis_feat, phr_feat, wv, bv, wp, bp, labels)
    jax.block_until_ready((losses, scores))

    # sanity vs. pure-JAX f32 reference (kernel uses bf16 MXU operands, so the
    # cross-precision tolerances are modest; row sums are exact now).
    ref_loss, ref_scores = _reference_vg(vis_feat, phr_feat, wv, bv, wp, bp, labels)
    row_sums = jnp.sum(scores, axis=-1)
    assert bool(jnp.all(jnp.abs(row_sums - 1.0) < 1e-4)), "softmax rows off"
    assert bool(jnp.max(jnp.abs(scores - ref_scores)) < 1e-2), "scores mismatch"
    assert bool(jnp.isfinite(losses["vg_match_loss"])), "non-finite loss"
    assert bool(jnp.abs(losses["vg_match_loss"] - ref_loss) < 2e-2), "loss mismatch"

    print("KERNEL_OK")
</pallas_src>

<mosaic_0001>
module attributes {stable_mosaic.version = 11 : i64} {
  func.func @_vg_head_kernel(%arg0: i32, %arg1: memref<1xi32, #tpu.memory_space<smem>>, %arg2: memref<1x32x256xf32, #tpu.memory_space<vmem>>, %arg3: memref<1x8x128xf32, #tpu.memory_space<vmem>>, %arg4: memref<256x128xf32, #tpu.memory_space<vmem>>, %arg5: memref<1x128xf32, #tpu.memory_space<vmem>>, %arg6: memref<128x128xf32, #tpu.memory_space<vmem>>, %arg7: memref<1x128xf32, #tpu.memory_space<vmem>>, %arg8: memref<1x8x1xi32, #tpu.memory_space<vmem>>, %arg9: memref<1x8x128xf32, #tpu.memory_space<vmem>>, %arg10: memref<1x1x1xf32, #tpu.memory_space<vmem>>, %arg11: memref<128x128xbf16, #tpu.memory_space<vmem>>) attributes {dimension_semantics = [#tpu.dimension_semantics<parallel>], iteration_bounds = array<i64: 2>, scalar_prefetch = 1 : i64, scratch_operands = 1 : i64, tpu.core_type = #tpu.core_type<tc>, window_params = [{transform_indices = @transform_0, window_bounds = array<i64: 1, 32, 256>}, {transform_indices = @transform_1, window_bounds = array<i64: 1, 8, 128>}, {pipeline_mode = #tpu.pipeline_mode<synchronous>, transform_indices = @transform_2, window_bounds = array<i64: 256, 128>}, {pipeline_mode = #tpu.pipeline_mode<synchronous>, transform_indices = @transform_3, window_bounds = array<i64: 1, 128>}, {pipeline_mode = #tpu.pipeline_mode<synchronous>, transform_indices = @transform_4, window_bounds = array<i64: 128, 128>}, {pipeline_mode = #tpu.pipeline_mode<synchronous>, transform_indices = @transform_5, window_bounds = array<i64: 1, 128>}, {transform_indices = @transform_6, window_bounds = array<i64: 1, 8, 1>}, {transform_indices = @transform_7, window_bounds = array<i64: 1, 8, 128>}, {transform_indices = @transform_8, window_bounds = array<i64: 1, 1, 1>}]} {
    %c0 = arith.constant 0 : index
    %0 = memref.load %arg1[%c0] : memref<1xi32, #tpu.memory_space<smem>>
    %c0_0 = arith.constant 0 : index
    %c0_1 = arith.constant 0 : index
    %c0_2 = arith.constant 0 : index
    %1 = vector.load %arg2[%c0_0, %c0_1, %c0_2] : memref<1x32x256xf32, #tpu.memory_space<vmem>>, vector<1x32x256xf32>
    %2 = vector.shape_cast %1 : vector<1x32x256xf32> to vector<32x256xf32>
    %3 = arith.truncf %2 : vector<32x256xf32> to vector<32x256xbf16>
    %c0_3 = arith.constant 0 : index
    %c0_4 = arith.constant 0 : index
    %4 = vector.load %arg4[%c0_3, %c0_4] : memref<256x128xf32, #tpu.memory_space<vmem>>, vector<256x128xf32>
    %5 = arith.truncf %4 : vector<256x128xf32> to vector<256x128xbf16>
    %cst = arith.constant dense<0.000000e+00> : vector<32x128xf32>
    %6 = tpu.matmul %3, %5, %cst {dimension_numbers = #tpu.dot_dimension_numbers<[1], [0], [0], [1], [0, 0, 1, 1], [], []>} : vector<32x256xbf16>, vector<256x128xbf16>, vector<32x128xf32> -> vector<32x128xf32>
    %c0_5 = arith.constant 0 : index
    %c0_6 = arith.constant 0 : index
    %7 = vector.load %arg5[%c0_5, %c0_6] : memref<1x128xf32, #tpu.memory_space<vmem>>, vector<1x128xf32>
    %8 = vector.broadcast %7 : vector<1x128xf32> to vector<32x128xf32>
    %9 = arith.addf %6, %8 : vector<32x128xf32>
    %c0_7 = arith.constant 0 : index
    %c0_8 = arith.constant 0 : index
    %c0_9 = arith.constant 0 : index
    %10 = vector.load %arg3[%c0_7, %c0_8, %c0_9] : memref<1x8x128xf32, #tpu.memory_space<vmem>>, vector<1x8x128xf32>
    %11 = vector.shape_cast %10 : vector<1x8x128xf32> to vector<8x128xf32>
    %12 = arith.truncf %11 : vector<8x128xf32> to vector<8x128xbf16>
    %c0_10 = arith.constant 0 : index
    %c0_11 = arith.constant 0 : index
    %13 = vector.load %arg6[%c0_10, %c0_11] : memref<128x128xf32, #tpu.memory_space<vmem>>, vector<128x128xf32>
    %14 = arith.truncf %13 : vector<128x128xf32> to vector<128x128xbf16>
    %cst_12 = arith.constant dense<0.000000e+00> : vector<8x128xf32>
    %15 = tpu.matmul %12, %14, %cst_12 {dimension_numbers = #tpu.dot_dimension_numbers<[1], [0], [0], [1], [0, 0, 1, 1], [], []>} : vector<8x128xbf16>, vector<128x128xbf16>, vector<8x128xf32> -> vector<8x128xf32>
    %c0_13 = arith.constant 0 : index
    %c0_14 = arith.constant 0 : index
    %16 = vector.load %arg7[%c0_13, %c0_14] : memref<1x128xf32, #tpu.memory_space<vmem>>, vector<1x128xf32>
    %17 = vector.broadcast %16 : vector<1x128xf32> to vector<8x128xf32>
    %18 = arith.addf %15, %17 : vector<8x128xf32>
    %19 = arith.mulf %9, %9 : vector<32x128xf32>
    %cst_15 = arith.constant dense<0.000000e+00> : vector<32xf32>
    %20 = vector.multi_reduction <add>, %19, %cst_15 [1] : vector<32x128xf32> to vector<32xf32>
    %21 = vector.shape_cast %20 : vector<32xf32> to vector<32x1xf32>
    %cst_16 = arith.constant 9.99999993E-9 : f32
    %22 = vector.broadcast %cst_16 : f32 to vector<32x1xf32>
    %23 = arith.addf %21, %22 : vector<32x1xf32>
    %24 = math.rsqrt %23 : vector<32x1xf32>
    %25 = vector.broadcast %24 : vector<32x1xf32> to vector<32x128xf32>
    %26 = arith.mulf %9, %25 : vector<32x128xf32>
    %27 = arith.mulf %18, %18 : vector<8x128xf32>
    %cst_17 = arith.constant dense<0.000000e+00> : vector<8xf32>
    %28 = vector.multi_reduction <add>, %27, %cst_17 [1] : vector<8x128xf32> to vector<8xf32>
    %29 = vector.shape_cast %28 : vector<8xf32> to vector<8x1xf32>
    %cst_18 = arith.constant 9.99999993E-9 : f32
    %30 = vector.broadcast %cst_18 : f32 to vector<8x1xf32>
    %31 = arith.addf %29, %30 : vector<8x1xf32>
    %32 = math.rsqrt %31 : vector<8x1xf32>
    %33 = vector.broadcast %32 : vector<8x1xf32> to vector<8x128xf32>
    %34 = arith.mulf %18, %33 : vector<8x128xf32>
    %cst_19 = arith.constant 0.000000e+00 : bf16
    %35 = vector.broadcast %cst_19 : bf16 to vector<96x128xbf16>
    %c32 = arith.constant 32 : index
    %c0_20 = arith.constant 0 : index
    %36 = vector.load %arg11[%c32, %c0_20] : memref<128x128xbf16, #tpu.memory_space<vmem>>, vector<96x128xbf16>
    tpu.vector_store %arg11[%c32, %c0_20], %35 {strides = array<i32>} : memref<128x128xbf16, #tpu.memory_space<vmem>>, vector<96x128xbf16>,
    %37 = arith.truncf %26 : vector<32x128xf32> to vector<32x128xbf16>
    %c0_21 = arith.constant 0 : index
    %c0_22 = arith.constant 0 : index
    %38 = vector.load %arg11[%c0_21, %c0_22] : memref<128x128xbf16, #tpu.memory_space<vmem>>, vector<32x128xbf16>
    tpu.vector_store %arg11[%c0_21, %c0_22], %37 {strides = array<i32>} : memref<128x128xbf16, #tpu.memory_space<vmem>>, vector<32x128xbf16>,
    %39 = arith.truncf %34 : vector<8x128xf32> to vector<8x128xbf16>
    %c0_23 = arith.constant 0 : index
    %c0_24 = arith.constant 0 : index
    %40 = vector.load %arg11[%c0_23, %c0_24] : memref<128x128xbf16, #tpu.memory_space<vmem>>, vector<128x128xbf16>
    %cst_25 = arith.constant dense<0.000000e+00> : vector<8x128xf32>
    %41 = tpu.matmul %39, %40, %cst_25 {dimension_numbers = #tpu.dot_dimension_numbers<[1], [1], [0], [0], [0, 0, 1, 0], [], []>} : vector<8x128xbf16>, vector<128x128xbf16>, vector<8x128xf32> -> vector<8x128xf32>
    %42 = tpu.iota {dimensions = array<i32: 1>} : vector<8x128xi32>
    %43 = vector.broadcast %0 : i32 to vector<8x128xi32>
    %44 = arith.cmpi slt, %42, %43 : vector<8x128xi32>
    %cst_26 = arith.constant -1.000000e+30 : f32
    %45 = vector.broadcast %cst_26 : f32 to vector<8x128xf32>
    %46 = arith.select %44, %41, %45 : vector<8x128xi1>, vector<8x128xf32>
    %cst_27 = arith.constant dense<0xFF800000> : vector<8xf32>
    %47 = vector.multi_reduction <maximumf>, %46, %cst_27 [1] : vector<8x128xf32> to vector<8xf32>
    %48 = vector.shape_cast %47 : vector<8xf32> to vector<8x1xf32>
    %49 = vector.broadcast %48 : vector<8x1xf32> to vector<8x128xf32>
    %50 = arith.subf %46, %49 : vector<8x128xf32>
    %51 = math.exp %50 : vector<8x128xf32>
    %cst_28 = arith.constant dense<0.000000e+00> : vector<8xf32>
    %52 = vector.multi_reduction <add>, %51, %cst_28 [1] : vector<8x128xf32> to vector<8xf32>
    %53 = vector.shape_cast %52 : vector<8xf32> to vector<8x1xf32>
    %54 = vector.broadcast %53 : vector<8x1xf32> to vector<8x128xf32>
    %55 = arith.divf %51, %54 : vector<8x128xf32>
    %c0_29 = arith.constant 0 : index
    %c0_30 = arith.constant 0 : index
    %c0_31 = arith.constant 0 : index
    %56 = vector.load %arg9[%c0_29, %c0_30, %c0_31] : memref<1x8x128xf32, #tpu.memory_space<vmem>>, vector<1x8x128xf32>
    %57 = vector.shape_cast %56 : vector<1x8x128xf32> to vector<8x128xf32>
    %58 = vector.shape_cast %55 : vector<8x128xf32> to vector<1x8x128xf32>
    tpu.vector_store %arg9[%c0_29, %c0_30, %c0_31], %58 {strides = array<i32>} : memref<1x8x128xf32, #tpu.memory_space<vmem>>, vector<1x8x128xf32>,
    %c0_32 = arith.constant 0 : index
    %c0_33 = arith.constant 0 : index
    %c0_34 = arith.constant 0 : index
    %59 = vector.load %arg8[%c0_32, %c0_33, %c0_34] : memref<1x8x1xi32, #tpu.memory_space<vmem>>, vector<1x8x1xi32>
    %60 = vector.shape_cast %59 : vector<1x8x1xi32> to vector<8x1xi32>
    %61 = vector.broadcast %60 : vector<8x1xi32> to vector<8x128xi32>
    %62 = arith.cmpi eq, %42, %61 : vector<8x128xi32>
    %cst_35 = arith.constant 0.000000e+00 : f32
    %63 = vector.broadcast %cst_35 : f32 to vector<8x128xf32>
    %64 = arith.select %62, %46, %63 : vector<8x128xi1>, vector<8x128xf32>
    %cst_36 = arith.constant dense<0.000000e+00> : vector<8xf32>
    %65 = vector.multi_reduction <add>, %64, %cst_36 [1] : vector<8x128xf32> to vector<8xf32>
    %66 = vector.shape_cast %65 : vector<8xf32> to vector<8x1xf32>
    %67 = math.log %53 : vector<8x1xf32>
    %68 = arith.addf %48, %67 : vector<8x1xf32>
    %69 = arith.subf %68, %66 : vector<8x1xf32>
    %70 = vector.shape_cast %69 : vector<8x1xf32> to vector<1x8x1xf32>
    %cst_37 = arith.constant dense<0.000000e+00> : vector<1xf32>
    %71 = vector.multi_reduction <add>, %70, %cst_37 [1, 2] : vector<1x8x1xf32> to vector<1xf32>
    %72 = vector.shape_cast %71 : vector<1xf32> to vector<1x1x1xf32>
    %73 = vector.extract %72[0, 0, 0] : f32 from vector<1x1x1xf32>
    %74 = vector.broadcast %73 : f32 to vector<1x1xf32>
    %c0_38 = arith.constant 0 : index
    %c0_39 = arith.constant 0 : index
    %c0_40 = arith.constant 0 : index
    %75 = vector.load %arg10[%c0_38, %c0_39, %c0_40] : memref<1x1x1xf32, #tpu.memory_space<vmem>>, vector<1x1x1xf32>
    %76 = vector.shape_cast %75 : vector<1x1x1xf32> to vector<1x1xf32>
    %77 = vector.shape_cast %74 : vector<1x1xf32> to vector<1x1x1xf32>
    tpu.vector_store %arg10[%c0_38, %c0_39, %c0_40], %77 {strides = array<i32>} : memref<1x1x1xf32, #tpu.memory_space<vmem>>, vector<1x1x1xf32>,
    return
  }
  func.func @transform_0(%arg0: i32, %arg1: memref<1xi32, #tpu.memory_space<smem>>) -> (i32, i32, i32) {
    %c0_i32 = arith.constant 0 : i32
    %c0_i32_0 = arith.constant 0 : i32
    %c0_i32_1 = arith.constant 0 : i32
    return %arg0, %c0_i32, %c0_i32_0 : i32, i32, i32
  }
  func.func @transform_1(%arg0: i32, %arg1: memref<1xi32, #tpu.memory_space<smem>>) -> (i32, i32, i32) {
    %c0_i32 = arith.constant 0 : i32
    %c0_i32_0 = arith.constant 0 : i32
    %c0_i32_1 = arith.constant 0 : i32
    return %arg0, %c0_i32, %c0_i32_0 : i32, i32, i32
  }
  func.func @transform_2(%arg0: i32, %arg1: memref<1xi32, #tpu.memory_space<smem>>) -> (i32, i32) {
    %c0_i32 = arith.constant 0 : i32
    %c0_i32_0 = arith.constant 0 : i32
    %c0_i32_1 = arith.constant 0 : i32
    return %c0_i32, %c0_i32_0 : i32, i32
  }
  func.func @transform_3(%arg0: i32, %arg1: memref<1xi32, #tpu.memory_space<smem>>) -> (i32, i32) {
    %c0_i32 = arith.constant 0 : i32
    %c0_i32_0 = arith.constant 0 : i32
    %c0_i32_1 = arith.constant 0 : i32
    return %c0_i32, %c0_i32_0 : i32, i32
  }
  func.func @transform_4(%arg0: i32, %arg1: memref<1xi32, #tpu.memory_space<smem>>) -> (i32, i32) {
    %c0_i32 = arith.constant 0 : i32
    %c0_i32_0 = arith.constant 0 : i32
    %c0_i32_1 = arith.constant 0 : i32
    return %c0_i32, %c0_i32_0 : i32, i32
  }
  func.func @transform_5(%arg0: i32, %arg1: memref<1xi32, #tpu.memory_space<smem>>) -> (i32, i32) {
    %c0_i32 = arith.constant 0 : i32
    %c0_i32_0 = arith.constant 0 : i32
    %c0_i32_1 = arith.constant 0 : i32
    return %c0_i32, %c0_i32_0 : i32, i32
  }
  func.func @transform_6(%arg0: i32, %arg1: memref<1xi32, #tpu.memory_space<smem>>) -> (i32, i32, i32) {
    %c0_i32 = arith.constant 0 : i32
    %c0_i32_0 = arith.constant 0 : i32
    %c0_i32_1 = arith.constant 0 : i32
    return %arg0, %c0_i32, %c0_i32_0 : i32, i32, i32
  }
  func.func @transform_7(%arg0: i32, %arg1: memref<1xi32, #tpu.memory_space<smem>>) -> (i32, i32, i32) {
    %c0_i32 = arith.constant 0 : i32
    %c0_i32_0 = arith.constant 0 : i32
    %c0_i32_1 = arith.constant 0 : i32
    return %arg0, %c0_i32, %c0_i32_0 : i32, i32, i32
  }
  func.func @transform_8(%arg0: i32, %arg1: memref<1xi32, #tpu.memory_space<smem>>) -> (i32, i32, i32) {
    %c0_i32 = arith.constant 0 : i32
    %c0_i32_0 = arith.constant 0 : i32
    %c0_i32_1 = arith.constant 0 : i32
    return %arg0, %c0_i32, %c0_i32_0 : i32, i32, i32
  }
}

</mosaic_0001>

<bundles_post_ra>
// kernel: tpu_custom_call.1
= control target key start
LH: loop header
LB: loop body
LE: loop exit
PB: predicated region body
PF: predicated region fallthrough
CT: control target
= control target key end

     0   :  { %s1520_s0 = inlined_call_operand.<no memory space> [shape: s32[1], index: 0, kind: input, shape index: {}]   ;;  %s1521_s1 = inlined_call_operand.hbm [shape: f32[2,32,256], index: 1, kind: input, shape index: {}]   ;;  %s1522_s2 = inlined_call_operand.vmem [shape: f32[2,8,128], index: 2, kind: input, shape index: {}]   ;;  %s1523_s3 = inlined_call_operand.hbm [shape: f32[256,128], index: 3, kind: input, shape index: {}]   ;;  %s1524_s4 = inlined_call_operand.vmem [shape: f32[1,128], index: 4, kind: input, shape index: {}]   ;;  %s1525_s5 = inlined_call_operand.hbm [shape: f32[128,128], index: 5, kind: input, shape index: {}]   ;;  %s1526_s6 = inlined_call_operand.vmem [shape: f32[1,128], index: 6, kind: input, shape index: {}]   ;;  %s1527_s7 = inlined_call_operand.vmem [shape: s32[2,8,1], index: 7, kind: input, shape index: {}]   ;;  %s1528_s8 = inlined_call_operand.hbm [shape: f32[2,8,128], index: 8, kind: output, shape index: {0}]   ;;  %s1529_s9 = inlined_call_operand.vmem [shape: f32[2,1,1], index: 9, kind: output, shape index: {1}]  }
   0x1   :  { %1530 = sst [smem:[#allocation15_spill]] %s1521_s1 }
   0x2   :  { %1531 = sst [smem:[#allocation16_spill]] %s1523_s3 }
   0x3   :  { %1532 = sst [smem:[#allocation17_spill]] %s1525_s5 }
   0x4   :  { %15 = sst [smem:[#allocation4]] %s1520_s0 }
   0x5   :  { %16 = vsyncpa [#allocation6], 0 }
   0x6   :  { %18 = vsyncpa [#allocation6 + $0x1], 0 }
   0x7   :  { %19 = vsyncpa [#allocation9], 0 }
   0x8   :  { %20 = vsyncpa [#allocation7], 0 }
   0x9   :  { %22 = vsyncpa [#allocation7 + $0x1], 0  ;;  %s1318_s11 = smov 0   ;;  %s1320_s12 = smov 0  }
   0xa   :  { %s1322_s13 = smov 0   ;;  %s1324_s14 = smov 0  }
   0xb LB: > { %s1339_s0 = sadd.s32 4294967295, %s1256_s14   ;;  %s932_s15 = sadd.s32 4294967294, %s1256_s14   ;;  %s1256_s14 = sphi %s1324_s14, %s1545_s14   ;;  %s1252_s13 = sphi %s1322_s13, %s1544_s13   ;;  %s1248_s12 = sphi %s1320_s12, %s1543_s12   ;;  %s1244_s11 = sphi %s1318_s11, %s1542_s11  }
   0xc   : > { %p48_p0 = scmp.ne.s32.totalorder %s1248_s12, %s1244_s11  ;;  %p49_p1 = scmp.eq.s32.totalorder %s1339_s0, 0 }
   0xd   : > { %p208_p2 = scmp.eq.s32.totalorder %s1339_s0, 1  ;;  %p214_p3 = scmp.eq.s32.totalorder %s932_s15, 1 }
   0xe   : > { %p1348_p4 = por %p49_p1, %p48_p0  ;;  %p933_p5 = scmp.ge.s32.totalorder %s1256_s14, 1 }
   0xf   : > { %p1353_p6 = por %p214_p3, %p48_p0  ;;  %p247_p7 = scmp.lt.s32.totalorder %s1256_s14, 3 }
  0x10   : > { %s1535_s3 = sld [smem:[#allocation16_spill]]  ;;  %s1258_s22 = smov [#allocation8]  }
  0x11   : > { %p1361_p8 = pnand %p933_p5, %p247_p7  ;;  %s260_s23 = sshll.u32 %s1258_s22, 4  ;;  %s261_s23 = int_to_ptr.vmem [resolvable:$true] %s260_s23 }
  0x12   : > { %s1537_s5 = sld [smem:[#allocation17_spill]]  ;;  %s1259_s27 = smov 128  }
  0x13   : > { %p1017_p9 = pneg %p1361_p8  ;;  %s1260_s28 = smov 8  }
  0x14   : > { %s1261_s29 = smov [#allocation10]   ;;  %s1374_s10 = sadd.s32 1, %s1256_s14  }
  0x15   : > { %p1018_p10 = pnand %p1017_p9, %p49_p1  ;;  %s277_s30 = sshll.u32 %s1261_s29, 4  ;;  %s278_s30 = int_to_ptr.vmem [resolvable:$true] %s277_s30 }
  0x16   : > { %s258_s20 = sshll.u32 %s1535_s3, 4  ;;  %s35_s15 = sadd.s32 1, %s1252_s13  ;;  %s259_s20 = int_to_ptr.hbm [resolvable:$true] %s258_s20 }
  0x17   : > { %1020 = dma.hbm_to_vmem [thread:$0]  (!%p1018_p10), %s259_s20, 4096, %s261_s23, [#allocation9], %s1259_s27, %s1259_s27, %s1260_s28  }
  0x18   : > { %s275_s26 = sshll.u32 %s1537_s5, 4  ;;  %s32_s18 = ssub.s32 %s1256_s14, %s1374_s10  ;;  %s276_s26 = int_to_ptr.hbm [resolvable:$true] %s275_s26 }
  0x19   : > { %1023 = dma.hbm_to_vmem [thread:$0]  (!%p1018_p10), %s276_s26, 2048, %s278_s30, [#allocation9], %s1259_s27, %s1259_s27, %s1260_s28  }
  0x1a   : > { %p42_p12 = scmp.ne.s32.totalorder %s1252_s13, %s1248_s12  ;;  %p33_p13 = scmp.eq.s32.totalorder %s32_s18, 0 }
  0x1b   : > { %p43_p0 = scmp.eq.s32.totalorder %s1256_s14, 0  ;;  %p1034_p5 = scmp.lt.s32.totalorder %s1256_s14, 2 }
  0x1c   : > { %p1384_p3 = por %p208_p2, %p42_p12  ;;  %s294_s22 = sand.u32 1, %s1252_s13  }
  0x1d   : > { %s1390_s20 = scalar_select %p33_p13, %s1252_s13, %s35_s15  }
  0x1e   : > { %p44_p7 = por %p43_p0, %p42_p12  ;;  %s937_s23 = sshll.u32 %s294_s22, 6 }
  0x1f   : > { %s983_s24 = sshll.u32 %s1256_s14, 6  ;;  %s1539_s1 = sld [smem:[#allocation15_spill]] }
  0x20   : > { %s298_s28 = scalar_lea.vmem [#allocation5], %s937_s23  ;;  %p1397_p2 = pnand %p1034_p5, %p44_p7 }
  0x21   : > { %s306_s29 = sshll.u32 %s298_s28, 4  ;;  %s295_s15 = scalar_lea.sflag [#allocation6], %s294_s22  ;;  %s307_s29 = int_to_ptr.vmem [resolvable:$true] %s306_s29 }
  0x22   : > { %p1160_p10 = pneg %p1397_p2 }
  0x25   : > { %s303_s27 = scalar_lea.hbm %s1539_s1, %s983_s24  ;;  %s1163_s25 = scalar_lea.hbm %s1539_s1, 128 }
  0x26   : > { %s304_s30 = sshll.u32 %s303_s27, 4  ;;  %s305_s30 = int_to_ptr.hbm [resolvable:$true] %s304_s30 }
  0x27   : > { %s1156_s3 = sshra.s32 %s305_s30, 4  ;;  %s1157_s3 = int_to_ptr.hbm [resolvable:$true] %s1156_s3 }
  0x28   : > { %s1158_s5 = scalar_lea.hbm %s1157_s3, 64  ;;  %p1164_p0 = scmp.lt.s32.totalorder %s1157_s3, %s1539_s1 }
  0x29   : > { %p1159_p9 = scmp.ne.s32.totalorder %s1157_s3, %s1158_s5  ;;  %p1165_p5 = scmp.lt.s32.totalorder %s1163_s25, %s1158_s5 }
  0x2b   : > { %p1161_p12 = pnand %p1160_p10, %p1159_p9  ;;  %p1166_p7 = por %p1165_p5, %p1164_p0 }
  0x2d   : > { %p1162_p13 = pneg %p1161_p12 }
  0x2f   : > { %p1167_p11 = pnand %p1166_p7, %p1162_p13 }
  0x31   : > { %1170 = shalt.err (!%p1167_p11)
}
  0x32   : > { %s1262_s22 = smov 256   ;;  %s1263_s28 = smov 16  }
  0x33   : > { %1027 = dma.hbm_to_vmem [thread:$0]  (!%p1397_p2), %s305_s30, 1024, %s307_s29, %s295_s15, %s1262_s22, %s1262_s22, %s1263_s28  }
  0x34   : > { %332 = sbr.rel (%p1361_p8) target bundleno = 984 (0x3d8), region = 48  ;;  %s1414_s24 = sand.u32 (!%p1361_p8), 1, %s1248_s12  }
  0x35   : > { %s941_s23 = sshll.u32 (!%p1361_p8), %s1414_s24, 6  ;;  %s335_s3 = scalar_lea.sflag (!%p1361_p8), [#allocation6], %s1414_s24 }
  0x36   : > { %s1418_s5 = scalar_lea.vmem (!%p1361_p8), [#allocation5], %s941_s23 }
  0x39   : > { %1231 = dma.done.wait (%p1348_p4), %s335_s3, 1024  }
  0x3a   : > { %1233 = vsyncadd (%p1348_p4), %s335_s3, 4294966272 }
  0x3b   : > { %1235 = dma.done.wait (%p49_p1), [#allocation9], 6144  }
  0x3c   : > { %1237 = vsyncadd (%p49_p1), [#allocation9], 4294961152  ;;  %v432_v0 = vld [vmem:[#allocation8 + $0x70] sm:$0xff]  ;;  %v433_v1 = vld [vmem:[#allocation8 + $0x78] sm:$0xff]  ;;  %p393_p1 = scmp.lt.s32.totalorder %s1339_s0, 1  ;;  %s405_s3 = sld [smem:[#allocation4]] }
  0x3d   : > { %v448_v2 = vld [vmem:[#allocation8 + $0xf0] sm:$0xff]  ;;  %v457_v3 = vpack.c.bf16 %v433_v1, %v432_v0  ;;  %v449_v4 = vld [vmem:[#allocation8 + $0xf8] sm:$0xff]  ;;  %v430_v9 = vld [vmem:[#allocation8 + $0x60] sm:$0xff]  ;;  %s980_s29 = sshll.u32 %s1339_s0, 3  ;;  %s779_s27 = scalar_lea.sflag [#allocation7], %s1414_s24 }
  0x3e   : > { %v524_v5 = vld [vmem:[#allocation10 + $0x70] sm:$0xff]  ;;  %v525_v6 = vld [vmem:[#allocation10 + $0x78] sm:$0xff]  ;;  %v465_v7 = vpack.c.bf16 %v449_v4, %v448_v2  ;;  %v431_v10 = vld [vmem:[#allocation8 + $0x68] sm:$0xff]  ;;  %s1430_s16 = scalar_select %p393_p1, %s1339_s0, 1 }
  0x3f   : > { %v533_v8 = vpack.c.bf16 %v525_v6, %v524_v5  ;;  %v446_v11 = vld [vmem:[#allocation8 + $0xe0] sm:$0xff]  ;;  %470 = vmatpush.bf16.msra.mxu0 %v457_v3  ;;  %v456_v12 = vpack.c.bf16 %v431_v10, %v430_v9  ;;  %v447_v13 = vld [vmem:[#allocation8 + $0xe8] sm:$0xff]  ;;  %v428_v18 = vld [vmem:[#allocation8 + $0x50] sm:$0xff]  ;;  %s792_s15 = scalar_lea.hbm %s1528_s8, %s980_s29  ;;  %s1206_s0 = scalar_lea.hbm %s1528_s8, 16 }
  0x40   : > { %v522_v14 = vld [vmem:[#allocation10 + $0x60] sm:$0xff]  ;;  %v523_v15 = vld [vmem:[#allocation10 + $0x68] sm:$0xff]  ;;  %489 = vmatpush.bf16.msra.mxu1 %v465_v7  ;;  %v464_v16 = vpack.c.bf16 %v447_v13, %v446_v11  ;;  %v429_v19 = vld [vmem:[#allocation8 + $0x58] sm:$0xff]  ;;  %s945_s21 = sshll.u32 %s1430_s16, 3  ;;  %s796_s26 = sshll.u32 %s792_s15, 4  ;;  %s797_s26 = int_to_ptr.hbm [resolvable:$true] %s796_s26 }
  0x41   : > { %538 = vmatpush.bf16.msra.mxu2 %v533_v8  ;;  %v532_v17 = vpack.c.bf16 %v523_v15, %v522_v14  ;;  %v444_v20 = vld [vmem:[#allocation8 + $0xd0] sm:$0xff]  ;;  %v445_v21 = vld [vmem:[#allocation8 + $0xd8] sm:$0xff]  ;;  %v455_v24 = vpack.c.bf16 %v429_v19, %v428_v18  ;;  %v426_v27 = vld [vmem:[#allocation8 + $0x40] sm:$0xff]  ;;  %s396_s18 = scalar_lea.vmem %s1522_s2, %s945_s21  ;;  %s400_s23 = scalar_lea.vmem %s1527_s7, %s945_s21 }
  0x42   : > { %v520_v22 = vld [vmem:[#allocation10 + $0x50] sm:$0xff]  ;;  %v521_v23 = vld [vmem:[#allocation10 + $0x58] sm:$0xff]  ;;  %v463_v25 = vpack.c.bf16 %v445_v21, %v444_v20  ;;  %v427_v28 = vld [vmem:[#allocation8 + $0x48] sm:$0xff]  ;;  %s1200_s22 = sshra.s32 %s797_s26, 4  ;;  %s1201_s22 = int_to_ptr.hbm [resolvable:$true] %s1200_s22 }
  0x43   : > { %471 = vmatpush.bf16.msra.mxu0 %v456_v12  ;;  %v531_v26 = vpack.c.bf16 %v521_v23, %v520_v22  ;;  %v442_v29 = vld [vmem:[#allocation8 + $0xc0] sm:$0xff]  ;;  %v443_v30 = vld [vmem:[#allocation8 + $0xc8] sm:$0xff]  ;;  %v454_v33 = vpack.c.bf16 %v427_v28, %v426_v27  ;;  %v424_v36 = vld [vmem:[#allocation8 + $0x30] sm:$0xff]  ;;  %s1202_s28 = scalar_lea.hbm %s1201_s22, 8  ;;  %p1207_p2 = scmp.lt.s32.totalorder %s1201_s22, %s1528_s8 }
  0x44   : > { %490 = vmatpush.bf16.msra.mxu1 %v464_v16  ;;  %v518_v31 = vld [vmem:[#allocation10 + $0x40] sm:$0xff]  ;;  %v519_v32 = vld [vmem:[#allocation10 + $0x48] sm:$0xff]  ;;  %v462_v34 = vpack.c.bf16 %v443_v30, %v442_v29  ;;  %v425_v37 = vld [vmem:[#allocation8 + $0x38] sm:$0xff]  ;;  %p1203_p4 = scmp.ne.s32.totalorder %s1201_s22, %s1202_s28  ;;  %p1208_p9 = scmp.lt.s32.totalorder %s1206_s0, %s1202_s28 }
  0x45   : > { %539 = vmatpush.bf16.msra.mxu2 %v532_v17  ;;  %v530_v35 = vpack.c.bf16 %v519_v32, %v518_v31  ;;  %v440_v38 = vld [vmem:[#allocation8 + $0xb0] sm:$0xff]  ;;  %v441_v39 = vld [vmem:[#allocation8 + $0xb8] sm:$0xff]  ;;  %v453_v42 = vpack.c.bf16 %v425_v37, %v424_v36  ;;  %v422_v45 = vld [vmem:[#allocation8 + $0x20] sm:$0xff] }
  0x46   : > { %v516_v40 = vld [vmem:[#allocation10 + $0x30] sm:$0xff]  ;;  %v517_v41 = vld [vmem:[#allocation10 + $0x38] sm:$0xff]  ;;  %v461_v43 = vpack.c.bf16 %v441_v39, %v440_v38  ;;  %v423_v46 = vld [vmem:[#allocation8 + $0x28] sm:$0xff]  ;;  %p1204_p8 = pnand %p1203_p4, %p1384_p3  ;;  %p1209_p10 = por %p1208_p9, %p1207_p2 }
  0x47   : > { %472 = vmatpush.bf16.msra.mxu0 %v455_v24  ;;  %v529_v44 = vpack.c.bf16 %v517_v41, %v516_v40  ;;  %v438_v47 = vld [vmem:[#allocation8 + $0xa0] sm:$0xff]  ;;  %v439_v48 = vld [vmem:[#allocation8 + $0xa8] sm:$0xff]  ;;  %v452_v51 = vpack.c.bf16 %v423_v46, %v422_v45  ;;  %v420_v54 = vld [vmem:[#allocation8 + $0x10] sm:$0xff] }
  0x48   : > { %491 = vmatpush.bf16.msra.mxu1 %v463_v25  ;;  %v514_v49 = vld [vmem:[#allocation10 + $0x20] sm:$0xff]  ;;  %v515_v50 = vld [vmem:[#allocation10 + $0x28] sm:$0xff]  ;;  %v460_v52 = vpack.c.bf16 %v439_v48, %v438_v47  ;;  %v421_v55 = vld [vmem:[#allocation8 + $0x18] sm:$0xff]  ;;  %v1264_v48 = vmov 0   ;;  %p1205_p11 = pneg %p1204_p8 }
  0x49   : > { %540 = vmatpush.bf16.msra.mxu2 %v531_v26  ;;  %v528_v53 = vpack.c.bf16 %v515_v50, %v514_v49  ;;  %v436_v56 = vld [vmem:[#allocation8 + $0x90] sm:$0xff]  ;;  %v437_v57 = vld [vmem:[#allocation8 + $0x98] sm:$0xff]  ;;  %v451_v60 = vpack.c.bf16 %v421_v55, %v420_v54  ;;  %v418_v63 = vld [vmem:[#allocation8] sm:$0xff]  ;;  %636 = vst [vmem:[#allocation2 + $0x38] sm:$0xf] %v1264_v48  ;;  %1077 = vset.pattern.permute.xlu0 %v1264_v48 }
  0x4a   : > { %v512_v58 = vld [vmem:[#allocation10 + $0x10] sm:$0xff]  ;;  %v513_v59 = vld [vmem:[#allocation10 + $0x18] sm:$0xff]  ;;  %v459_v61 = vpack.c.bf16 %v437_v57, %v436_v56  ;;  %v419_v0 = vld [vmem:[#allocation8 + $0x8] sm:$0xff]  ;;  %637 = vst [vmem:[#allocation2 + $0x3c] sm:$0xf] %v1264_v48  ;;  %p1210_p12 = pnand %p1209_p10, %p1205_p11 }
  0x4b   : > { %473 = vmatpush.bf16.msra.mxu0 %v454_v33  ;;  %v527_v62 = vpack.c.bf16 %v513_v59, %v512_v58  ;;  %v434_v1 = vld [vmem:[#allocation8 + $0x80] sm:$0xff]  ;;  %v435_v2 = vld [vmem:[#allocation8 + $0x88] sm:$0xff]  ;;  %v450_v5 = vpack.c.bf16 %v419_v0, %v418_v63  ;;  %v408_v7 = vld [vmem:[%s1418_s5 + $0x10] sm:$0xff]  ;;  %626 = vst [vmem:[#allocation2 + $0x10] sm:$0xf] %v1264_v48 }
  0x4c   : > { %492 = vmatpush.bf16.msra.mxu1 %v462_v34  ;;  %v510_v3 = vld [vmem:[#allocation10] sm:$0xff]  ;;  %v511_v4 = vld [vmem:[#allocation10 + $0x8] sm:$0xff]  ;;  %v458_v8 = vpack.c.bf16 %v435_v2, %v434_v1  ;;  %v409_v11 = vld [vmem:[%s1418_s5 + $0x18] sm:$0xff]  ;;  %627 = vst [vmem:[#allocation2 + $0x14] sm:$0xf] %v1264_v48 }
  0x4d   : > { %541 = vmatpush.bf16.msra.mxu2 %v530_v35  ;;  %v406_v6 = vld [vmem:[%s1418_s5] sm:$0xff]  ;;  %v526_v9 = vpack.c.bf16 %v511_v4, %v510_v3  ;;  %v407_v10 = vld [vmem:[%s1418_s5 + $0x8] sm:$0xff]  ;;  %v412_v17 = vld [vmem:[%s1418_s5 + $0x30] sm:$0xff]  ;;  %628 = vst [vmem:[#allocation2 + $0x18] sm:$0xf] %v1264_v48 }
  0x4e   : > { %v508_v12 = vld [vmem:[%s396_s18] sm:$0xff]  ;;  %v414_v13 = vpack.c.bf16 %v408_v7, %v406_v6  ;;  %v415_v14 = vpack.c.bf16 %v409_v11, %v407_v10  ;;  %v411_v18 = vld [vmem:[%s1418_s5 + $0x28] sm:$0xff]  ;;  %v413_v19 = vld [vmem:[%s1418_s5 + $0x38] sm:$0xff]  ;;  %629 = vst [vmem:[#allocation2 + $0x1c] sm:$0xf] %v1264_v48 }
  0x4f   : > { %474 = vmatpush.bf16.msra.mxu0 %v453_v42  ;;  %v509_v15 = vpack.c.bf16 %v508_v12, %v508_v12  ;;  %v410_v16 = vld [vmem:[%s1418_s5 + $0x20] sm:$0xff]  ;;  %v417_v21 = vpack.c.bf16 %v413_v19, %v411_v18  ;;  %630 = vst [vmem:[#allocation2 + $0x20] sm:$0xf] %v1264_v48  ;;  %s944_s5 = sshll.u32 %s1414_s24, 3 }
  0x50   : > { %493 = vmatpush.bf16.msra.mxu1 %v461_v43  ;;  %v416_v20 = vpack.c.bf16 %v412_v17, %v410_v16  ;;  %v1078_v22 = vld [vmem:[%s1524_s4] ss:$0 sm:$0xff]  ;;  %631 = vst [vmem:[#allocation2 + $0x24] sm:$0xf] %v1264_v48  ;;  %s387_s21 = scalar_lea.vmem [#allocation11], %s944_s5 }
  0x51   : > { %542 = vmatpush.bf16.msra.mxu2 %v529_v44  ;;  %v1079_v27 = vld [vmem:[%s1526_s6] ss:$0 sm:$0xff]  ;;  %v991_v49 = vld [vmem:[#allocation2 + $0x38] sm:$0xff]  ;;  %632 = vst [vmem:[#allocation2 + $0x28] sm:$0xf] %v1264_v48  ;;  %s794_s25 = sshll.u32 %s387_s21, 4  ;;  %s795_s25 = int_to_ptr.vmem [resolvable:$true] %s794_s25 }
  0x52   : > { %633 = vst [vmem:[#allocation2 + $0x2c] sm:$0xf] %v1264_v48  ;;  %711 = vmatpush.bf16.xpose.msra.mxu3 %v991_v49 }
  0x53   : > { %475 = vmatpush.bf16.msra.mxu0 %v452_v51  ;;  %634 = vst [vmem:[#allocation2 + $0x30] sm:$0xf] %v1264_v48  ;;  %v986_v3 = vld [vmem:[#allocation2 + $0x10] sm:$0xff] }
  0x54   : > { %494 = vmatpush.bf16.msra.mxu1 %v460_v52  ;;  %635 = vst [vmem:[#allocation2 + $0x34] sm:$0xf] %v1264_v48 }
  0x55   : > { %543 = vmatpush.bf16.msra.mxu2 %v528_v53  ;;  %v987_v59 = vld [vmem:[#allocation2 + $0x18] sm:$0xff] }
  0x57   : > { %476 = vmatpush.bf16.msra.mxu0 %v451_v60  ;;  %v988_v54 = vld [vmem:[#allocation2 + $0x20] sm:$0xff] }
  0x58   : > { %495 = vmatpush.bf16.msra.mxu1 %v459_v61 }
  0x59   : > { %544 = vmatpush.bf16.msra.mxu2 %v527_v62  ;;  %v989_v51 = vld [vmem:[#allocation2 + $0x28] sm:$0xff] }
  0x5b   : > { %477 = vmatpush.bf16.msra.mxu0 %v450_v5  ;;  %v990_v50 = vld [vmem:[#allocation2 + $0x30] sm:$0xff] }
  0x5c   : > { %496 = vmatpush.bf16.msra.mxu1 %v458_v8  ;;  %712 = vmatpush.bf16.xpose.msra.mxu3 %v990_v50  ;;  %v726_v50 = vstv %s405_s3 }
  0x5d   : > { %545 = vmatpush.bf16.msra.mxu2 %v526_v9 }
  0x5e   : > { %478 = vmatmul.bf16.vlgmr.msra.gmra.mxu0 %v414_v13 }
  0x5f   : > { %497 = vmatmul.bf16.vlgmr.msra.gmra.mxu1 %v415_v14 }
  0x60   : > { %546 = vmatmul.bf16.vlgmr.msra.gmra.mxu2 %v509_v15 }
  0x64   : > { %713 = vmatpush.bf16.xpose.msra.mxu3 %v989_v51 }
  0x6c   : > { %714 = vmatpush.bf16.xpose.msra.mxu3 %v988_v54 }
  0x6e   : > { %483 = vmatmul.bf16.gmra.mxu0 %v416_v20 }
  0x6f   : > { %502 = vmatmul.bf16.gmra.mxu1 %v417_v21 }
  0x74   : > { %715 = vmatpush.bf16.xpose.msra.mxu3 %v987_v59 }
  0x7c   : > { %716 = vmatpush.bf16.xpose.msra.mxu3 %v986_v3 }
  0xdb   : > { %v479_v23 = vpop.f32.mrf.mxu0 }
  0xdc   : > { %v480_v24 = vadd.f32 %v1078_v22, %v479_v23  ;;  %v498_v25 = vpop.f32.mrf.mxu1 }
  0xde   : > { %v1449_v26 = vadd.f32 %v498_v25, %v480_v24 }
  0xe0   : > { %v551_v28 = vmul.f32 %v1449_v26, %v1449_v26 }
  0xe2   : > { %555 = vadd.xlane.f32.xlu1 %v551_v28 }
  0xe3   : > { %v547_v29 = vpop.f32.mrf.mxu2  ;;  %v481_v31 = vpop.f32.mrf.mxu0 }
  0xe4   : > { %v1456_v30 = vadd.f32 %v1079_v27, %v547_v29  ;;  %v482_v32 = vadd.f32 %v1078_v22, %v481_v31  ;;  %v500_v33 = vpop.f32.mrf.mxu1  ;;  %v752_v31 = vld [vmem:[%s400_s23] sm:$0xff] }
  0xe6   : > { %v611_v34 = vmul.f32 %v1456_v30, %v1456_v30  ;;  %v1460_v35 = vadd.f32 %v500_v33, %v482_v32 }
  0xe8   : > { %612 = vadd.xlane.f32.xlu2 %v611_v34  ;;  %v552_v36 = vmul.f32 %v1460_v35, %v1460_v35 }
  0xea   : > { %557 = vadd.xlane.f32.xlu1 %v552_v36 }
  0xeb   : > { %v549_v37 = vpop.f32.mrf.mxu2  ;;  %v484_v38 = vpop.f32.mrf.mxu0 }
  0xec   : > { %v485_v39 = vadd.f32 %v1078_v22, %v484_v38  ;;  %v503_v40 = vpop.f32.mrf.mxu1 }
  0xee   : > { %v1464_v41 = vadd.f32 %v503_v40, %v485_v39 }
  0xf0   : > { %v553_v42 = vmul.f32 %v1464_v41, %v1464_v41 }
  0xf2   : > { %559 = vadd.xlane.f32.xlu0 %v553_v42 }
  0xf3   : > { %v486_v43 = vpop.f32.mrf.mxu0 }
  0xf4   : > { %v487_v44 = vadd.f32 %v1078_v22, %v486_v43  ;;  %v505_v45 = vpop.f32.mrf.mxu1 }
  0xf6   : > { %v1468_v46 = vadd.f32 %v505_v45, %v487_v44 }
  0xf8   : > { %v554_v47 = vmul.f32 %v1468_v46, %v1468_v46 }
  0xfa   : > { %561 = vadd.xlane.f32.xlu0 %v554_v47 }
 0x10e   : > { %754 = vperm.xlu0 %1077, %v752_v31  }
 0x155   : > { %v556_v52 = vpop.xlane.xlu1 %555 }
 0x156   : > { %v563_v53 = vadd.f32 1e-08, %v556_v52 }
 0x158   : > { %1080 = vrsqrt.f32 %v563_v53  ;;  %vm573_vm1 = vweird.f32 %v563_v53 }
 0x15b   : > { %v613_v14 = vpop.xlane.xlu2 %612 }
 0x15c   : > { %v614_v20 = vadd.f32 1e-08, %v613_v14 }
 0x15d   : > { %v558_v55 = vpop.xlane.xlu1 %557 }
 0x15e   : > { %v1081_v56 = vpop.eup %1080  ;;  %v564_v57 = vadd.f32 1e-08, %v558_v55  ;;  %vm621_vm12 = vweird.f32 %v614_v20 }
 0x15f   : > { %v568_v58 = vmul.f32 %v1081_v56, %v563_v53  ;;  %vm574_vm0 = vweird.f32 %v1081_v56 }
 0x160   : > { %1082 = vrsqrt.f32 %v564_v57  ;;  %vm575_vm3 = vmor %vm573_vm1, %vm574_vm0  ;;  %vm583_vm4 = vweird.f32 %v564_v57 }
 0x161   : > { %v569_v60 = vmul.f32 %v1081_v56, %v568_v58 }
 0x163   : > { %v570_v61 = vmul.f32 0.5, %v569_v60 }
 0x165   : > { %v560_v62 = vpop.xlane.xlu0 %559  ;;  %v571_v1 = vsub.f32 1.5, %v570_v61 }
 0x166   : > { %v1083_v63 = vpop.eup %1082  ;;  %v565_v0 = vadd.f32 1e-08, %v560_v62 }
 0x167   : > { %v578_v2 = vmul.f32 %v1083_v63, %v564_v57  ;;  %v572_v5 = vmul.f32 %v1081_v56, %v571_v1  ;;  %vm584_vm2 = vweird.f32 %v1083_v63 }
 0x168   : > { %1084 = vrsqrt.f32 %v565_v0  ;;  %vm585_vm5 = vmor %vm583_vm4, %vm584_vm2  ;;  %vm593_vm7 = vweird.f32 %v565_v0  ;;  %vm764_vm2 = vcmask 7168  }
 0x169   : > { %v579_v4 = vmul.f32 %v1083_v63, %v578_v2  ;;  %v576_v11 = vsel %vm575_vm3, %v1081_v56, %v572_v5 }
 0x16a   : > { %v607_v17 = vmul.f32 %v576_v11, %v1449_v26 }
 0x16b   : > { %v580_v6 = vmul.f32 0.5, %v579_v4 }
 0x16d   : > { %v581_v7 = vsub.f32 1.5, %v580_v6  ;;  %v562_v8 = vpop.xlane.xlu0 %561 }
 0x16e   : > { %v1085_v9 = vpop.eup %1084  ;;  %v566_v10 = vadd.f32 1e-08, %v562_v8 }
 0x16f   : > { %v582_v12 = vmul.f32 %v1083_v63, %v581_v7  ;;  %v588_v13 = vmul.f32 %v1085_v9, %v565_v0  ;;  %vm594_vm6 = vweird.f32 %v1085_v9 }
 0x170   : > { %1086 = vrsqrt.f32 %v566_v10  ;;  %vm595_vm9 = vmor %vm593_vm7, %vm594_vm6  ;;  %vm603_vm10 = vweird.f32 %v566_v10 }
 0x171   : > { %v586_v15 = vsel %vm585_vm5, %v1083_v63, %v582_v12  ;;  %v589_v16 = vmul.f32 %v1085_v9, %v588_v13  ;;  %1088 = vrsqrt.f32 %v614_v20 }
 0x172   : > { %v608_v18 = vmul.f32 %v586_v15, %v1460_v35 }
 0x173   : > { %v590_v19 = vmul.f32 0.5, %v589_v16 }
 0x174   : > { %v995_v21 = vpack.c.bf16 %v608_v18, %v607_v17 }
 0x175   : > { %v591_v23 = vsub.f32 1.5, %v590_v19 }
 0x176   : > { %v1087_v22 = vpop.eup %1086  ;;  %996 = vst [vmem:[#allocation2] sm:$0xff] %v995_v21  }
 0x177   : > { %v598_v24 = vmul.f32 %v1087_v22, %v566_v10  ;;  %v592_v27 = vmul.f32 %v1085_v9, %v591_v23  ;;  %vm604_vm8 = vweird.f32 %v1087_v22  ;;  %v1089_v29 = vpop.eup %1088 }
 0x178   : > { %vm605_vm11 = vmor %vm603_vm10, %vm604_vm8  ;;  %v616_v34 = vmul.f32 %v1089_v29, %v614_v20  ;;  %vm622_vm13 = vweird.f32 %v1089_v29 }
 0x179   : > { %v599_v25 = vmul.f32 %v1087_v22, %v598_v24  ;;  %v596_v32 = vsel %vm595_vm9, %v1085_v9, %v592_v27  ;;  %vm623_vm14 = vmor %vm621_vm12, %vm622_vm13 }
 0x17a   : > { %v609_v36 = vmul.f32 %v596_v32, %v1464_v41  ;;  %v617_v39 = vmul.f32 %v1089_v29, %v616_v34  ;;  %v724_v41 = vlaneseq }
 0x17b   : > { %v600_v28 = vmul.f32 0.5, %v599_v25 }
 0x17c   : > { %v618_v40 = vmul.f32 0.5, %v617_v39 }
 0x17d   : > { %v601_v26 = vsub.f32 1.5, %v600_v28  ;;  %v984_v45 = vld [vmem:[#allocation2] sm:$0xff] }
 0x17e   : > { %v619_v42 = vsub.f32 1.5, %v618_v40 }
 0x17f   : > { %v602_v33 = vmul.f32 %v1087_v22, %v601_v26 }
 0x180   : > { %v620_v44 = vmul.f32 %v1089_v29, %v619_v42  ;;  %v755_v53 = vpop.permute.xlu0 %754 }
 0x181   : > { %v606_v35 = vsel %vm605_vm11, %v1087_v22, %v602_v33 }
 0x182   : > { %v610_v37 = vmul.f32 %v606_v35, %v1468_v46  ;;  %v624_v47 = vsel %vm623_vm14, %v1089_v29, %v620_v44  ;;  %v725_v46 = vand.u32 127, %v724_v41 }
 0x183   : > { %v625_v48 = vmul.f32 %v624_v47, %v1456_v30 }
 0x184   : > { %v1000_v38 = vpack.c.bf16 %v610_v37, %v609_v36  ;;  %vm727_vm15 = vcmp.lt.s32.totalorder %v725_v46, %v726_v50  ;;  %vm756_vm0 = vcmp.eq.s32.totalorder %v725_v46, %v755_v53 }
 0x185   : > { %v646_v49 = vpack.c.bf16 %v625_v48, %v625_v48 }
 0x186   : > { %1002 = vst [vmem:[#allocation2 + $0x8] sm:$0xff] %v1000_v38  }
 0x18d   : > { %v985_v43 = vld [vmem:[#allocation2 + $0x8] sm:$0xff] }
 0x18e   : > { %717 = vmatpush.bf16.xpose.msra.mxu3 %v985_v43 }
 0x196   : > { %718 = vmatpush.bf16.xpose.msra.mxu3 %v984_v45 }
 0x19d   : > { %719 = vmatmul.bf16.vlgmr.msra.gmra.mxu3 %v646_v49 }
 0x220   : > { %v720_v51 = vpop.f32.mrf.mxu3 }
 0x221   : > { %v728_v52 = vsel %vm727_vm15, %v720_v51, -1e+30 }
 0x222   : > { %729 = vmax.xlane.f32.xlu2 %v728_v52  ;;  %v757_v55 = vsel %vm756_vm0, %v728_v52, 0.0 }
 0x228   : > { %v722_v54 = vpop.f32.mrf.mxu3 }
 0x22a   : > { %758 = vadd.xlane.f32.xlu2 %v757_v55 }
 0x295   : > { %v730_v56 = vpop.xlane.xlu2 %729 }
 0x296   : > { %v731_v57 = vsub.f32 %v728_v52, %v730_v56 }
 0x298   : > { %v732_v58 = vmul.f32 1.442695, %v731_v57 }
 0x29a   : > { %1090 = vpow2.f32 %v732_v58 }
 0x29d   : > { %v759_v3 = vpop.xlane.xlu2 %758 }
 0x2a0   : > { %v1091_v30 = vpop.eup %1090 }
 0x2a1   : > { %734 = vadd.xlane.f32.xlu1 %v1091_v30 }
 0x314   : > { %v735_v59 = vpop.xlane.xlu1 %734 }
 0x315   : > { %1092 = vrcp.f32 %v735_v59  ;;  %v747_v1 = vand.u32 2147483648, %v735_v59  ;;  %v745_v5 = vand.u32 2147483647, %v735_v59  ;;  %vm741_vm3 = vweird.f32 %v735_v59 }
 0x316   : > { %1094 = vlog2.f32 %v735_v59 }
 0x317   : > { %v748_v8 = vor.u32 1.1754944e-38, %v747_v1  ;;  %vm746_vm5 = vcmp.eq.f32.partialorder %v745_v5, 8.507059e+37 }
 0x31b   : > { %v1093_v60 = vpop.eup %1092 }
 0x31c   : > { %v1095_v61 = vpop.eup %1094  ;;  %v737_v62 = vmul.f32 %v1093_v60, %v735_v59  ;;  %vm742_vm1 = vweird.f32 %v1093_v60 }
 0x31d   : > { %v761_v63 = vmul.f32 0.6931472, %v1095_v61  ;;  %vm743_vm4 = vmor %vm741_vm3, %vm742_vm1 }
 0x31e   : > { %v738_v0 = vsub.f32 1.0, %v737_v62 }
 0x31f   : > { %v762_v2 = vadd.f32 %v761_v63, %v730_v56 }
 0x320   : > { %v739_v4 = vmul.f32 %v1093_v60, %v738_v0 }
 0x321   : > { %v763_v6 = vsub.f32 %v762_v2, %v759_v3 }
 0x322   : > { %v740_v7 = vadd.f32 %v1093_v60, %v739_v4 }
 0x323   : > { %v765_v9 = vsel %vm764_vm2, %v763_v6, 0.0 }
 0x324   : > { %766 = vadd.xlane.f32.xlu1 %v765_v9  ;;  %v744_v10 = vsel %vm743_vm4, %v1093_v60, %v740_v7 }
 0x325   : > { %v749_v11 = vsel %vm746_vm5, %v748_v8, %v744_v10 }
 0x326   : > { %v750_v12 = vmul.f32 %v1091_v30, %v749_v11 }
 0x328   : > { %751 = vst [vmem:[%s387_s21] sm:$0xff] %v750_v12 }
 0x329   : > { %1213 = shalt.err (!%p1210_p12)
}
 0x32a   : > { %1015 = dma.vmem_to_hbm [thread:$0]  (%p1384_p3), %s795_s25, 128, %s797_s26, %s779_s27   ;;  %vm776_vm6 = vcmask 0  }
 0x32b   : > { %s403_s1 = scalar_lea.vmem %s1529_s9, %s1430_s16 }
 0x397   : > { %v767_v13 = vpop.xlane.xlu1 %766 }
 0x398   : > { %v768_v14 = vrot.slane %v767_v13, 4 }
 0x39a   : > { %v769_v15 = vadd.f32 %v768_v14, %v767_v13 }
 0x39c   : > { %v770_v16 = vrot.slane %v769_v15, 2 }
 0x39e   : > { %v771_v17 = vadd.f32 %v770_v16, %v769_v15 }
 0x3a0   : > { %v772_v18 = vrot.slane %v771_v17, 1 }
 0x3a2   : > { %v773_v19 = vadd.f32 %v772_v18, %v771_v17 }
 0x3a4   : > { %1003 = vpush %v773_v19 }
 0x3d5   : > { %s1004_s29 = spop %1003 }
 0x3d6   : > { %v775_v20 = vstv %s1004_s29 }
 0x3d7   : > { %777 = vst.msk [vmem:[%s403_s1] sm:$0x1] %vm776_vm6, %v775_v20 }
 0x3d8 PF: > { %s811_s19 = sand.u32 1, %s1244_s11   ;;  %p1541_p3 = scmp.ge.s32.totalorder %s1256_s14, 2 }
 0x3d9   : > { %s812_s30 = scalar_lea.sflag [#allocation7], %s811_s19 }
 0x3da   : > { %p1029_p13 = pnand %p1541_p3, %p1353_p6 }
 0x3dc   : > { %p1030_p0 = pneg %p1029_p13 }
 0x3de   : > { %1239 = dma.done.wait (%p1030_p0), %s812_s30, 128  }
 0x3df   : > { %1241 = vsyncadd (%p1030_p0), %s812_s30, 4294967168  ;;  %p25_p5 = scmp.ge.s32.totalorder %s1374_s10, 4   ;;  %s1542_s11 = smov %s1248_s12 }
 0x3e0   : > { %s1543_s12 = smov %s1252_s13  ;;  %s1544_s13 = smov %s1390_s20 }
 0x3e1   : > { %s1545_s14 = smov %s1374_s10  ;;  %27 = sbr.rel (!%p25_p5) target bundleno = 11 (0xb), region = 119 }
 0x3e6   :  { %824 = vsyncpa [#allocation6], 1 }
 0x3e7   :  { %826 = vsyncpa [#allocation6 + $0x1], 1 }
 0x3e8   :  { %827 = vsyncpa [#allocation9], 1 }
 0x3e9   :  { %828 = vsyncpa [#allocation7], 1 }
 0x3ea   :  { %830 = vsyncpa [#allocation7 + $0x1], 1 }

</bundles_post_ra>
